<compile_context>
chip_gen: v6e
topology: v6e:2x2x1
jax: 0.10.0
libtpu: 0.0.40
codegen_flags: <defaults>
</compile_context>

<pallas_src>
import jax
import jax.numpy as jnp
import numpy as np
from jax.experimental import pallas as pl
from jax.experimental.pallas import tpu as pltpu

# Module configuration (synthetic, deterministic).
ATTRIBUTES = ("poi", "hour", "dow")
VOCAB = {"poi": 40, "hour": 24, "dow": 7}
EMB = {k: 16 for k in ATTRIBUTES}          # embedding_size per attribute
WINDOW = 2
L_CTX = 2 * WINDOW                         # context length (4)
CLASS_DIM = sum(EMB.values())              # 48
K_FLAT = L_CTX * CLASS_DIM                 # 192: flattened context features
V_TOTAL = sum(VOCAB.values())              # 71
V_PAD = 128                                # lane-dense output width (MXU N tile)
BM_CAP = 2048                              # fixed batch-tile cap (all gens OK)


def gcbow_kernel(x_ref, w_ref, b_ref, o_ref):
    """x_ref: (BM, K_FLAT) bf16 weight-folded, context-flattened embeddings
               (batch dense on sublanes, features on lanes);
       w_ref: (K_FLAT, V_PAD) bf16 vertically-stacked fused classifier weight
               (resident across the grid);
       b_ref: (1, V_PAD) f32 fused + zero-padded classifier bias (resident);
       o_ref: (BM, V_PAD) f32 lane-dense logits.
       Masked mean + all classification heads collapse into one MXU matmul."""
    o_ref[...] = (
        jnp.dot(x_ref[...], w_ref[...], preferred_element_type=jnp.float32)
        + b_ref[...]
    )


def _round_up(n, m):
    return ((n + m - 1) // m) * m


def _pick_bm(b):
    """Fixed large batch tile: multiple of 16 (bf16 native (16,128) sublane
    tile), capped at BM_CAP.  The batch is padded UP to a multiple of this
    instead of searching for a divisor of B (no BM=8 degeneration)."""
    return min(BM_CAP, _round_up(max(b, 1), 16))


def gcbow_pallas(xw, w_pad, b_pad, bm):
    rows, k = xw.shape                     # rows already padded to multiple of bm
    v = w_pad.shape[1]                     # V_PAD (128)
    assert rows % bm == 0
    grid = (rows // bm,)
    return pl.pallas_call(
        gcbow_kernel,
        out_shape=jax.ShapeDtypeStruct((rows, v), jnp.float32),
        grid_spec=pltpu.PrefetchScalarGridSpec(
            num_scalar_prefetch=0,
            grid=grid,
            in_specs=[
                pl.BlockSpec((bm, k), lambda i: (i, 0)),     # activations (bf16)
                pl.BlockSpec((k, v), lambda i: (0, 0)),      # stacked W resident
                pl.BlockSpec((1, v), lambda i: (0, 0)),      # bias resident
            ],
            out_specs=pl.BlockSpec((bm, v), lambda i: (i, 0)),  # lane-dense out
        ),
        compiler_params=pltpu.CompilerParams(
            dimension_semantics=("parallel",)),
    )(xw, w_pad, b_pad)


def init_params(key):
    """Deterministic synthetic parameters matching the module's shapes."""
    params = {}
    lim = 1.0 / np.sqrt(CLASS_DIM)
    for k in ATTRIBUTES:
        key, k1, k2, k3 = jax.random.split(key, 4)
        # nn.Embedding(vocab, emb): weight (vocab, emb), N(0, 1) init.
        params["embed_" + k] = jax.random.normal(
            k1, (VOCAB[k], EMB[k]), jnp.float32)
        # nn.Linear(class_dim, vocab): stored here already transposed (D, V).
        params["class_w_" + k] = jax.random.uniform(
            k2, (CLASS_DIM, VOCAB[k]), jnp.float32, -lim, lim)
        params["class_b_" + k] = jax.random.uniform(
            k3, (VOCAB[k],), jnp.float32, -lim, lim)
    return params


def fuse_classifier_params(params):
    """One-time prep (hoisted out of the forward): fuse the per-head classifier
    weights/biases, stack the weight vertically L_CTX times (so the flattened
    (B, L*D) weighted activations hit it with a single matmul, equivalent to
    classify(masked-mean(context))), zero-pad to a lane-dense 128 columns and
    cast the weight to bf16 for the MXU."""
    w = jnp.concatenate([params["class_w_" + k] for k in ATTRIBUTES], axis=1)
    b = jnp.concatenate([params["class_b_" + k] for k in ATTRIBUTES])
    w_stack = jnp.tile(w, (L_CTX, 1))                               # (L*D, V)
    w_pad = jnp.zeros((K_FLAT, V_PAD), jnp.float32).at[:, :V_TOTAL].set(w_stack)
    b_pad = jnp.zeros((1, V_PAD), jnp.float32).at[:, :V_TOTAL].set(b)
    return w_pad.astype(jnp.bfloat16), b_pad


def grouped_cbow_forward(params, fused_wb, x, lens):
    """x: (B, L, n_attrs) int32 (L = 2*window context tokens); lens: (B,) int32
    in [1, 2*window] (per GroupedCBOW.fit / _prepare_training_data).
    Returns a list of per-attribute logits [(B, vocab[k]) ...]."""
    w_pad, bias_pad = fused_wb
    B, L, _ = x.shape
    # Embedding gathers (JAX glue), concatenated to (B, L, D).
    embs = [jnp.take(params["embed_" + k], x[:, :, i], axis=0)
            for i, k in enumerate(ATTRIBUTES)]
    xe = jnp.concatenate(embs, axis=-1)                             # (B, L, D) f32
    # Masked mean folded into the gather output: per-token weight
    # wt[b, l] = (l < len_b) / len_b.  lens clamped to [1, L] so a zero-length
    # sample yields bias-only logits instead of inf/nan (fit() invariant).
    eff = jnp.clip(lens, 1, L).astype(jnp.float32)                  # (B,)
    wt = (jnp.arange(L, dtype=jnp.float32)[None, :]
          < eff[:, None]).astype(jnp.float32) / eff[:, None]        # (B, L)
    xw = (xe * wt[:, :, None]).astype(jnp.bfloat16)                 # (B, L, D) bf16
    xw = xw.reshape(B, L * CLASS_DIM)                               # (B, K_FLAT)
    # Fixed batch tile: pad B up to a multiple of BM; padded rows are all-zero
    # (bias-only logits) and are sliced off below.
    bm = _pick_bm(B)
    rows = _round_up(B, bm)
    if rows != B:
        xw = jnp.pad(xw, ((0, rows - B), (0, 0)))

    out = gcbow_pallas(xw, w_pad, bias_pad, bm)                     # (rows, V_PAD)
    out = out[:B, :V_TOTAL]                                         # drop padding
    splits = list(np.cumsum([VOCAB[k] for k in ATTRIBUTES])[:-1])
    return jnp.split(out, splits, axis=1)


def reference_forward(params, x, lens):
    """Pure-JAX f32 reference reproducing GroupedCBOW.forward semantics."""
    embs = [jnp.take(params["embed_" + k], x[:, :, i], axis=0)
            for i, k in enumerate(ATTRIBUTES)]
    xe = jnp.concatenate(embs, axis=-1)
    L = xe.shape[1]
    eff = jnp.minimum(lens, L).astype(jnp.float32)
    mask = (jnp.arange(L)[None, :] < eff[:, None]).astype(jnp.float32)
    xm = (xe * mask[:, :, None]).sum(axis=1) / eff[:, None]
    return [xm @ params["class_w_" + k] + params["class_b_" + k]
            for k in ATTRIBUTES]


if __name__ == "__main__":
    params = init_params(jax.random.PRNGKey(0))
    fused_wb = fuse_classifier_params(params)    # hoisted parameter prep

    B, L = 8, 2 * WINDOW
    kx, kl = jax.random.split(jax.random.PRNGKey(1))
    x = jnp.stack(
        [jax.random.randint(jax.random.fold_in(kx, i), (B, L), 0, VOCAB[k])
         for i, k in enumerate(ATTRIBUTES)],
        axis=-1,
    ).astype(jnp.int32)                                             # (B, L, 3)
    # lens sorted ascending, in [1, 2*window], as fit() provides.
    lens = jnp.sort(jax.random.randint(kl, (B,), 1, L + 1)).astype(jnp.int32)

    fwd = jax.jit(grouped_cbow_forward)
    out = fwd(params, fused_wb, x, lens)
    out = jax.block_until_ready(out)

    ref = reference_forward(params, x, lens)
    # bf16 activations/weights on the MXU (f32 accumulate): ~2e-2 tolerance.
    for o, r in zip(out, ref):
        np.testing.assert_allclose(np.asarray(o), np.asarray(r),
                                   rtol=2e-2, atol=2e-2)
    print("KERNEL_OK")
</pallas_src>

<mosaic_0001>
module attributes {stable_mosaic.version = 11 : i64} {
  func.func @gcbow_kernel(%arg0: i32, %arg1: memref<16x192xbf16, #tpu.memory_space<vmem>>, %arg2: memref<192x128xbf16, #tpu.memory_space<vmem>>, %arg3: memref<1x128xf32, #tpu.memory_space<vmem>>, %arg4: memref<16x128xf32, #tpu.memory_space<vmem>>) attributes {dimension_semantics = [#tpu.dimension_semantics<parallel>], iteration_bounds = array<i64: 1>, scalar_prefetch = 0 : i64, scratch_operands = 0 : i64, tpu.core_type = #tpu.core_type<tc>, window_params = [{transform_indices = @transform_0, window_bounds = array<i64: 16, 192>}, {pipeline_mode = #tpu.pipeline_mode<synchronous>, transform_indices = @transform_1, window_bounds = array<i64: 192, 128>}, {pipeline_mode = #tpu.pipeline_mode<synchronous>, transform_indices = @transform_2, window_bounds = array<i64: 1, 128>}, {transform_indices = @transform_3, window_bounds = array<i64: 16, 128>}]} {
    %c0 = arith.constant 0 : index
    %c0_0 = arith.constant 0 : index
    %0 = vector.load %arg1[%c0, %c0_0] : memref<16x192xbf16, #tpu.memory_space<vmem>>, vector<16x192xbf16>
    %c0_1 = arith.constant 0 : index
    %c0_2 = arith.constant 0 : index
    %1 = vector.load %arg2[%c0_1, %c0_2] : memref<192x128xbf16, #tpu.memory_space<vmem>>, vector<192x128xbf16>
    %cst = arith.constant dense<0.000000e+00> : vector<16x128xf32>
    %2 = tpu.matmul %0, %1, %cst {dimension_numbers = #tpu.dot_dimension_numbers<[1], [0], [0], [1], [0, 0, 1, 1], [], []>} : vector<16x192xbf16>, vector<192x128xbf16>, vector<16x128xf32> -> vector<16x128xf32>
    %c0_3 = arith.constant 0 : index
    %c0_4 = arith.constant 0 : index
    %3 = vector.load %arg3[%c0_3, %c0_4] : memref<1x128xf32, #tpu.memory_space<vmem>>, vector<1x128xf32>
    %4 = vector.broadcast %3 : vector<1x128xf32> to vector<16x128xf32>
    %5 = arith.addf %2, %4 : vector<16x128xf32>
    %c0_5 = arith.constant 0 : index
    %c0_6 = arith.constant 0 : index
    %6 = vector.load %arg4[%c0_5, %c0_6] : memref<16x128xf32, #tpu.memory_space<vmem>>, vector<16x128xf32>
    tpu.vector_store %arg4[%c0_5, %c0_6], %5 {strides = array<i32>} : memref<16x128xf32, #tpu.memory_space<vmem>>, vector<16x128xf32>,
    return
  }
  func.func @transform_0(%arg0: i32) -> (i32, i32) {
    %c0_i32 = arith.constant 0 : i32
    %c0_i32_0 = arith.constant 0 : i32
    return %arg0, %c0_i32 : i32, i32
  }
  func.func @transform_1(%arg0: i32) -> (i32, i32) {
    %c0_i32 = arith.constant 0 : i32
    %c0_i32_0 = arith.constant 0 : i32
    %c0_i32_1 = arith.constant 0 : i32
    return %c0_i32, %c0_i32_0 : i32, i32
  }
  func.func @transform_2(%arg0: i32) -> (i32, i32) {
    %c0_i32 = arith.constant 0 : i32
    %c0_i32_0 = arith.constant 0 : i32
    %c0_i32_1 = arith.constant 0 : i32
    return %c0_i32, %c0_i32_0 : i32, i32
  }
  func.func @transform_3(%arg0: i32) -> (i32, i32) {
    %c0_i32 = arith.constant 0 : i32
    %c0_i32_0 = arith.constant 0 : i32
    return %arg0, %c0_i32 : i32, i32
  }
}

</mosaic_0001>

<bundles_post_ra>
// kernel: split.0
= control target key start
LH: loop header
LB: loop body
LE: loop exit
PB: predicated region body
PF: predicated region fallthrough
CT: control target
= control target key end

     0   :  { %2 = vsyncpa [#allocation6], 0  ;;  %s55_s0 = inlined_call_operand.vmem [shape: f32[16,128], index: 0, kind: input, shape index: {}]   ;;  %s56_s1 = inlined_call_operand.hbm [shape: f32[8,40], index: 1, kind: output, shape index: {}]  }
   0x1   :  { %v3_v0 = vld [vmem:[%s55_s0] sm:$0xff]  ;;  %s38_s0 = smov [#allocation5]  }
   0x2   :  { %4 = vst [vmem:[#allocation5] sm:$0xff] %v3_v0  ;;  %s9_s8 = sshll.u32 %s38_s0, 4  ;;  %s10_s8 = int_to_ptr.vmem [resolvable:$true] %s9_s8 }
   0x3   :  { %s16_s9 = scalar_lea.vmem %s10_s8, 128  ;;  %p21_p1 = scmp.lt.s32.totalorder %s10_s8, %s10_s8 }
   0x4   :  { %p17_p0 = scmp.ne.s32.totalorder %s10_s8, %s16_s9  ;;  %p22_p2 = scmp.lt.s32.totalorder %s16_s9, %s16_s9 }
   0x6   :  { %p23_p3 = por %p22_p2, %p21_p1 }
   0x8   :  { %p24_p4 = pnand %p23_p3, %p17_p0 }
   0xa   :  { %27 = shalt.err (!%p24_p4)
}
   0xb   :  { %12 = dma.vmem_to_hbm [thread:$0]  %s10_s8, 128, %s56_s1, [#allocation6]  }
   0xc   :  { %36 = dma.done.wait [#allocation6], 128  }
   0xd   :  { %37 = vsyncadd [#allocation6], 4294967168 }
   0xe   :  { %14 = vsyncpa [#allocation6], 1 }

// kernel: split.1
= control target key start
LH: loop header
LB: loop body
LE: loop exit
PB: predicated region body
PF: predicated region fallthrough
CT: control target
= control target key end

     0   :  { %v4_v0 = vlaneseq  ;;  %s63_s0 = inlined_call_operand.vmem [shape: f32[16,128], index: 0, kind: input, shape index: {}]   ;;  %s64_s1 = inlined_call_operand.hbm [shape: f32[8,24], index: 1, kind: output, shape index: {}]  }
   0x1   :  { %2 = vsyncpa [#allocation6], 0  ;;  %v3_v1 = vld [vmem:[%s63_s0] sm:$0xff]  ;;  %s45_s0 = smov 88   ;;  %s46_s8 = smov [#allocation5]  }
   0x2   :  { %v5_v2 = vand.u32 127, %v4_v0  ;;  %s15_s9 = sshll.u32 %s46_s8, 4  ;;  %s16_s9 = int_to_ptr.vmem [resolvable:$true] %s15_s9 }
   0x3   :  { %s23_s10 = scalar_lea.vmem %s16_s9, 128  ;;  %p28_p1 = scmp.lt.s32.totalorder %s16_s9, %s16_s9 }
   0x4   :  { %vm6_vm0 = vcmp.lt.s32.totalorder %v5_v2, 40  ;;  %p24_p0 = scmp.ne.s32.totalorder %s16_s9, %s23_s10  ;;  %p29_p2 = scmp.lt.s32.totalorder %s23_s10, %s23_s10 }
   0x5   :  { %v7_v3 = vsel %vm6_vm0, 0, %v3_v1 }
   0x6   :  { %8 = vrot.lane.b32.xlu0 %v7_v3, %s45_s0  ;;  %p30_p3 = por %p29_p2, %p28_p1 }
   0x8   :  { %p31_p4 = pnand %p30_p3, %p24_p0 }
  0x78   :  { %v9_v4 = vpop.permute.xlu0 %8 }
  0x79   :  { %10 = vst [vmem:[#allocation5] sm:$0xff] %v9_v4 }
  0x7a   :  { %34 = shalt.err (!%p31_p4)
}
  0x7b   :  { %18 = dma.vmem_to_hbm [thread:$0]  %s16_s9, 128, %s64_s1, [#allocation6]  }
  0x7c   :  { %43 = dma.done.wait [#allocation6], 128  }
  0x7d   :  { %44 = vsyncadd [#allocation6], 4294967168 }
  0x7e   :  { %20 = vsyncpa [#allocation6], 1 }

// kernel: split.2
= control target key start
LH: loop header
LB: loop body
LE: loop exit
PB: predicated region body
PF: predicated region fallthrough
CT: control target
= control target key end

     0   :  { %v4_v0 = vlaneseq  ;;  %s63_s0 = inlined_call_operand.vmem [shape: f32[16,128], index: 0, kind: input, shape index: {}]   ;;  %s64_s1 = inlined_call_operand.hbm [shape: f32[8,7], index: 1, kind: output, shape index: {}]  }
   0x1   :  { %2 = vsyncpa [#allocation6], 0  ;;  %v3_v1 = vld [vmem:[%s63_s0] sm:$0xff]  ;;  %s45_s0 = smov 64   ;;  %s46_s8 = smov [#allocation5]  }
   0x2   :  { %v5_v2 = vand.u32 127, %v4_v0  ;;  %s15_s9 = sshll.u32 %s46_s8, 4  ;;  %s16_s9 = int_to_ptr.vmem [resolvable:$true] %s15_s9 }
   0x3   :  { %s23_s10 = scalar_lea.vmem %s16_s9, 128  ;;  %p28_p1 = scmp.lt.s32.totalorder %s16_s9, %s16_s9 }
   0x4   :  { %vm6_vm0 = vcmp.lt.s32.totalorder %v5_v2, 64  ;;  %p24_p0 = scmp.ne.s32.totalorder %s16_s9, %s23_s10  ;;  %p29_p2 = scmp.lt.s32.totalorder %s23_s10, %s23_s10 }
   0x5   :  { %v7_v3 = vsel %vm6_vm0, 0, %v3_v1 }
   0x6   :  { %8 = vrot.lane.b32.xlu0 %v7_v3, %s45_s0  ;;  %p30_p3 = por %p29_p2, %p28_p1 }
   0x8   :  { %p31_p4 = pnand %p30_p3, %p24_p0 }
  0x78   :  { %v9_v4 = vpop.permute.xlu0 %8 }
  0x79   :  { %10 = vst [vmem:[#allocation5] sm:$0xff] %v9_v4 }
  0x7a   :  { %34 = shalt.err (!%p31_p4)
}
  0x7b   :  { %18 = dma.vmem_to_hbm [thread:$0]  %s16_s9, 128, %s64_s1, [#allocation6]  }
  0x7c   :  { %43 = dma.done.wait [#allocation6], 128  }
  0x7d   :  { %44 = vsyncadd [#allocation6], 4294967168 }
  0x7e   :  { %20 = vsyncpa [#allocation6], 1 }

// kernel: grouped_cbow_forward.1
= control target key start
LH: loop header
LB: loop body
LE: loop exit
PB: predicated region body
PF: predicated region fallthrough
CT: control target
= control target key end

     0   :  { %v212_v0 = vmov 0   ;;  %vm129_vm0 = vcmask 523264   ;;  %s284_s1 = inlined_call_operand.vmem [shape: bf16[192,128], index: 1, kind: input, shape index: {}]   ;;  %s285_s0 = inlined_call_operand.vmem [shape: bf16[16,192], index: 0, kind: input, shape index: {}]   ;;  %s286_s2 = inlined_call_operand.vmem [shape: f32[1,128], index: 2, kind: input, shape index: {}]   ;;  %s287_s3 = inlined_call_operand.vmem [shape: f32[16,128], index: 3, kind: output, shape index: {}]  }
   0x1   :  { %133 = vmatprep.subr.bf16.mxu0 %v212_v0  ;;  %v197_v1 = vld [vmem:[%s284_s1 + $0x38] sm:$0xff]   ;;  %v198_v2 = vld [vmem:[%s284_s1 + $0x30] sm:$0xff]   ;;  %v199_v3 = vld [vmem:[%s284_s1 + $0x28] sm:$0xff]  }
   0x2   :  { %134 = vmatpush1.bf16.msra.mxu0 %v197_v1  ;;  %v200_v4 = vld [vmem:[%s284_s1 + $0x20] sm:$0xff]   ;;  %v201_v6 = vld [vmem:[%s284_s1 + $0x18] sm:$0xff]   ;;  %v202_v7 = vld [vmem:[%s284_s1 + $0x10] sm:$0xff]  }
   0x3   :  { %135 = vmatprep.subr.bf16.mxu0 %v212_v0  ;;  %v211_v5 = vld [vmem:[%s285_s0 + $0x4] ss:$8 sps:$4 sm:$0xff]   ;;  %v205_v10 = vld [vmem:[%s284_s1 + $0x58] sm:$0xff]   ;;  %v206_v11 = vld [vmem:[%s284_s1 + $0x50] sm:$0xff]  }
   0x4   :  { %195 = vmatprep.mubr.msk.bf16.mxu0 %vm129_vm0, %v211_v5  ;;  %v203_v8 = vld [vmem:[%s284_s1 + $0x8] sm:$0xff]   ;;  %v204_v9 = vld [vmem:[%s284_s1] sm:$0xff]  }
   0x5   :  { %v207_v12 = vld [vmem:[%s284_s1 + $0x48] sm:$0xff]   ;;  %v208_v13 = vld [vmem:[%s284_s1 + $0x40] sm:$0xff]  }
   0x6   :  { %136 = vmatpush1.bf16.msra.mxu0 %v198_v2  ;;  %v209_v14 = vld [vmem:[%s285_s0] ss:$8 sps:$4 sm:$0xff]  }
   0x7   :  { %137 = vmatprep.subr.bf16.mxu0 %v212_v0  ;;  %v180_v15 = vld [vmem:[%s286_s2] ss:$0 sm:$0xff] }
   0xa   :  { %138 = vmatpush1.bf16.msra.mxu0 %v199_v3 }
   0xb   :  { %139 = vmatprep.subr.bf16.mxu0 %v212_v0 }
   0xe   :  { %140 = vmatpush1.bf16.msra.mxu0 %v200_v4 }
   0xf   :  { %141 = vmatprep.subr.bf16.mxu0 %v212_v0 }
  0x12   :  { %142 = vmatpush1.bf16.msra.mxu0 %v201_v6 }
  0x13   :  { %143 = vmatprep.subr.bf16.mxu0 %v212_v0 }
  0x16   :  { %144 = vmatpush1.bf16.msra.mxu0 %v202_v7 }
  0x17   :  { %145 = vmatprep.subr.bf16.mxu0 %v212_v0 }
  0x1a   :  { %146 = vmatpush1.bf16.msra.mxu0 %v203_v8 }
  0x1b   :  { %147 = vmatprep.subr.bf16.mxu0 %v212_v0 }
  0x1e   :  { %148 = vmatpush1.bf16.msra.mxu0 %v204_v9 }
  0x1f   :  { %157 = vmatprep.subr.bf16.mxu0 %v212_v0 }
  0x22   :  { %158 = vmatpush2.bf16.msra.mxu0 %v205_v10 }
  0x23   :  { %159 = vmatprep.subr.bf16.mxu0 %v212_v0 }
  0x26   :  { %160 = vmatpush2.bf16.msra.mxu0 %v206_v11 }
  0x27   :  { %161 = vmatprep.subr.bf16.mxu0 %v212_v0 }
  0x2a   :  { %162 = vmatpush2.bf16.msra.mxu0 %v207_v12 }
  0x2b   :  { %163 = vmatprep.subr.bf16.mxu0 %v212_v0 }
  0x2e   :  { %164 = vmatpush2.bf16.msra.mxu0 %v208_v13 }
  0x31   :  { %166 = vmatmul.mubr.bf16.vlgmr.msra.gmra.mxu0 %v209_v14 }
  0xf1   :  { %v167_v16 = vpop.f32.mrf.mxu0 }
  0xf2   :  { %v168_v17 = vadd.f32 %v180_v15, %v167_v16 }
  0xf3   :  { %v169_v18 = vpop.f32.mrf.mxu0 }
  0xf4   :  { %174 = vst [vmem:[%s287_s3] sm:$0xff] %v168_v17 }
  0xf5   :  { %v170_v19 = vpop.f32.mrf.mxu0 }
  0xf6   :  { %v171_v20 = vadd.f32 %v180_v15, %v170_v19 }
  0xf7   :  { %v172_v21 = vpop.f32.mrf.mxu0 }
  0xf8   :  { %175 = vst [vmem:[%s287_s3 + $0x8] sm:$0xff] %v171_v20 }

</bundles_post_ra>
